<compile_context>
chip_gen: v6e
topology: v6e:2x2x1
jax: 0.10.0
libtpu: 0.0.40
codegen_flags: <defaults>
</compile_context>

<pallas_src>
import jax
import jax.numpy as jnp
import numpy as np
from jax.experimental import pallas as pl
from jax.experimental.pallas import tpu as pltpu


# ----------------------------------------------------------------------------
# Kernel: whole MVGRL discriminator forward, fused.
# ----------------------------------------------------------------------------
def _mvgrl_disc_kernel(bias_ref, c1_ref, c2_ref,
                       h1_ref, h2_ref, h3_ref, h4_ref, w_ref, o_ref):
    B = c1_ref.shape[0]
    bias = bias_ref[0]                # scalar bias from SMEM
    w = w_ref[...]                    # (n_h, n_h)

    # Wc[b, i] = sum_j W[i, j] * c[b, j]  ==  c @ W^T.
    # Stack c1/c2 along sublanes -> a single MXU weight push for both
    # summary vectors; contract dim 1 of both operands so no transposed
    # copy of W is materialized.
    c_all = jnp.concatenate([c1_ref[...], c2_ref[...]], axis=0)   # (2B, n_h)
    dnums = (((1,), (1,)), ((), ()))
    wc_all = jax.lax.dot_general(c_all, w, dnums,
                                 preferred_element_type=jnp.float32)  # (2B, n_h)
    wc1 = wc_all[:B]                  # (B, n_h)
    wc2 = wc_all[B:]                  # (B, n_h)

    def score(h_ref, wc):
        # h: (B, N, n_h), wc: (B, n_h) -> (B, N).
        # Broadcast along the node (sublane) axis on the VPU, reduce over
        # the lane axis on the XLU.  Memory-bound: 1 mul + 1 add per h elem.
        return jnp.sum(h_ref[...] * wc[:, None, :], axis=2) + bias

    sc1 = score(h2_ref, wc1)
    sc2 = score(h1_ref, wc2)
    sc3 = score(h4_ref, wc1)
    sc4 = score(h3_ref, wc2)

    # Single store of the full (B, 4N) logits block.
    o_ref[...] = jnp.concatenate([sc1, sc2, sc3, sc4], axis=1)


# ----------------------------------------------------------------------------
# Wrapper: one pallas_call, full-array blocks (shapes are tiny).
# ----------------------------------------------------------------------------
def mvgrl_discriminator(c1, c2, h1, h2, h3, h4, w, bias):
    B, N, _ = h1.shape
    vmem = pl.BlockSpec(memory_space=pltpu.VMEM)
    smem = pl.BlockSpec(memory_space=pltpu.SMEM)
    return pl.pallas_call(
        _mvgrl_disc_kernel,
        out_shape=jax.ShapeDtypeStruct((B, 4 * N), jnp.float32),
        in_specs=[smem, vmem, vmem, vmem, vmem, vmem, vmem, vmem],
        out_specs=vmem,
    )(bias, c1, c2, h1, h2, h3, h4, w)


# ----------------------------------------------------------------------------
# Demo / correctness check
# ----------------------------------------------------------------------------
if __name__ == "__main__":
    n_h, B, N = 32, 2, 8   # hidden dim, batch of graphs, nodes per graph

    key = jax.random.PRNGKey(0)
    kc1, kc2, kh1, kh2, kh3, kh4, kw = jax.random.split(key, 7)

    c1 = jax.random.normal(kc1, (B, n_h), jnp.float32)
    c2 = jax.random.normal(kc2, (B, n_h), jnp.float32)
    h1 = jax.random.normal(kh1, (B, N, n_h), jnp.float32)
    h2 = jax.random.normal(kh2, (B, N, n_h), jnp.float32)
    h3 = jax.random.normal(kh3, (B, N, n_h), jnp.float32)
    h4 = jax.random.normal(kh4, (B, N, n_h), jnp.float32)

    # nn.Bilinear(n_h, n_h, 1): weight (1, n_h, n_h) xavier_uniform_, bias 0.
    fan_in, fan_out = n_h * n_h, 1 * n_h
    bound = float(np.sqrt(6.0 / (fan_in + fan_out)))
    w = jax.random.uniform(kw, (n_h, n_h), jnp.float32, -bound, bound)
    bias = jnp.zeros((1,), jnp.float32)

    logits = mvgrl_discriminator(c1, c2, h1, h2, h3, h4, w, bias)
    logits = jax.block_until_ready(logits)

    # pure-JAX reference (same math as torch.nn.Bilinear)
    def _ref(c1, c2, h1, h2, h3, h4, w, bias):
        def f_k(h, c):
            return jnp.einsum('bni,ij,bj->bn', h, w, c) + bias[0]
        return jnp.concatenate(
            [f_k(h2, c1), f_k(h1, c2), f_k(h4, c1), f_k(h3, c2)], axis=1)

    expected = _ref(c1, c2, h1, h2, h3, h4, w, bias)
    assert logits.shape == (B, 4 * N)
    assert np.allclose(np.asarray(logits), np.asarray(expected),
                       rtol=1e-4, atol=1e-4)
    print("KERNEL_OK")
</pallas_src>

<mosaic_0001>
module attributes {stable_mosaic.version = 11 : i64} {
  func.func @_mvgrl_disc_kernel(%arg0: memref<1xf32, #tpu.memory_space<smem>>, %arg1: memref<2x32xf32, #tpu.memory_space<vmem>>, %arg2: memref<2x32xf32, #tpu.memory_space<vmem>>, %arg3: memref<2x8x32xf32, #tpu.memory_space<vmem>>, %arg4: memref<2x8x32xf32, #tpu.memory_space<vmem>>, %arg5: memref<2x8x32xf32, #tpu.memory_space<vmem>>, %arg6: memref<2x8x32xf32, #tpu.memory_space<vmem>>, %arg7: memref<32x32xf32, #tpu.memory_space<vmem>>, %arg8: memref<2x32xf32, #tpu.memory_space<vmem>>) attributes {dimension_semantics = [], scalar_prefetch = 0 : i64, scratch_operands = 0 : i64, tpu.core_type = #tpu.core_type<tc>} {
    %c0 = arith.constant 0 : index
    %0 = memref.load %arg0[%c0] : memref<1xf32, #tpu.memory_space<smem>>
    %c0_0 = arith.constant 0 : index
    %c0_1 = arith.constant 0 : index
    %1 = vector.load %arg7[%c0_0, %c0_1] : memref<32x32xf32, #tpu.memory_space<vmem>>, vector<32x32xf32>
    %c0_2 = arith.constant 0 : index
    %c0_3 = arith.constant 0 : index
    %2 = vector.load %arg1[%c0_2, %c0_3] : memref<2x32xf32, #tpu.memory_space<vmem>>, vector<2x32xf32>
    %c0_4 = arith.constant 0 : index
    %c0_5 = arith.constant 0 : index
    %3 = vector.load %arg2[%c0_4, %c0_5] : memref<2x32xf32, #tpu.memory_space<vmem>>, vector<2x32xf32>
    %4 = tpu.concatenate %2, %3 in 0 : vector<2x32xf32>, vector<2x32xf32> -> vector<4x32xf32>
    %cst = arith.constant dense<0.000000e+00> : vector<4x32xf32>
    %5 = tpu.matmul %4, %1, %cst {dimension_numbers = #tpu.dot_dimension_numbers<[1], [1], [0], [0], [0, 0, 1, 0], [], []>} : vector<4x32xf32>, vector<32x32xf32>, vector<4x32xf32> -> vector<4x32xf32>
    %6 = vector.extract_strided_slice %5 {offsets = [0, 0], sizes = [2, 32], strides = [1, 1]} : vector<4x32xf32> to vector<2x32xf32>
    %7 = vector.extract_strided_slice %5 {offsets = [2, 0], sizes = [2, 32], strides = [1, 1]} : vector<4x32xf32> to vector<2x32xf32>
    %c0_6 = arith.constant 0 : index
    %c0_7 = arith.constant 0 : index
    %c0_8 = arith.constant 0 : index
    %8 = vector.load %arg4[%c0_6, %c0_7, %c0_8] : memref<2x8x32xf32, #tpu.memory_space<vmem>>, vector<2x8x32xf32>
    %9 = vector.shape_cast %6 : vector<2x32xf32> to vector<2x1x32xf32>
    %10 = vector.broadcast %9 : vector<2x1x32xf32> to vector<2x8x32xf32>
    %11 = arith.mulf %8, %10 : vector<2x8x32xf32>
    %cst_9 = arith.constant dense<0.000000e+00> : vector<2x8xf32>
    %12 = vector.multi_reduction <add>, %11, %cst_9 [2] : vector<2x8x32xf32> to vector<2x8xf32>
    %13 = vector.broadcast %0 : f32 to vector<2x8xf32>
    %14 = arith.addf %12, %13 : vector<2x8xf32>
    %c0_10 = arith.constant 0 : index
    %c0_11 = arith.constant 0 : index
    %c0_12 = arith.constant 0 : index
    %15 = vector.load %arg3[%c0_10, %c0_11, %c0_12] : memref<2x8x32xf32, #tpu.memory_space<vmem>>, vector<2x8x32xf32>
    %16 = vector.shape_cast %7 : vector<2x32xf32> to vector<2x1x32xf32>
    %17 = vector.broadcast %16 : vector<2x1x32xf32> to vector<2x8x32xf32>
    %18 = arith.mulf %15, %17 : vector<2x8x32xf32>
    %cst_13 = arith.constant dense<0.000000e+00> : vector<2x8xf32>
    %19 = vector.multi_reduction <add>, %18, %cst_13 [2] : vector<2x8x32xf32> to vector<2x8xf32>
    %20 = vector.broadcast %0 : f32 to vector<2x8xf32>
    %21 = arith.addf %19, %20 : vector<2x8xf32>
    %c0_14 = arith.constant 0 : index
    %c0_15 = arith.constant 0 : index
    %c0_16 = arith.constant 0 : index
    %22 = vector.load %arg6[%c0_14, %c0_15, %c0_16] : memref<2x8x32xf32, #tpu.memory_space<vmem>>, vector<2x8x32xf32>
    %23 = vector.shape_cast %6 : vector<2x32xf32> to vector<2x1x32xf32>
    %24 = vector.broadcast %23 : vector<2x1x32xf32> to vector<2x8x32xf32>
    %25 = arith.mulf %22, %24 : vector<2x8x32xf32>
    %cst_17 = arith.constant dense<0.000000e+00> : vector<2x8xf32>
    %26 = vector.multi_reduction <add>, %25, %cst_17 [2] : vector<2x8x32xf32> to vector<2x8xf32>
    %27 = vector.broadcast %0 : f32 to vector<2x8xf32>
    %28 = arith.addf %26, %27 : vector<2x8xf32>
    %c0_18 = arith.constant 0 : index
    %c0_19 = arith.constant 0 : index
    %c0_20 = arith.constant 0 : index
    %29 = vector.load %arg5[%c0_18, %c0_19, %c0_20] : memref<2x8x32xf32, #tpu.memory_space<vmem>>, vector<2x8x32xf32>
    %30 = vector.shape_cast %7 : vector<2x32xf32> to vector<2x1x32xf32>
    %31 = vector.broadcast %30 : vector<2x1x32xf32> to vector<2x8x32xf32>
    %32 = arith.mulf %29, %31 : vector<2x8x32xf32>
    %cst_21 = arith.constant dense<0.000000e+00> : vector<2x8xf32>
    %33 = vector.multi_reduction <add>, %32, %cst_21 [2] : vector<2x8x32xf32> to vector<2x8xf32>
    %34 = vector.broadcast %0 : f32 to vector<2x8xf32>
    %35 = arith.addf %33, %34 : vector<2x8xf32>
    %36 = tpu.concatenate %14, %21, %28, %35 in 1 : vector<2x8xf32>, vector<2x8xf32>, vector<2x8xf32>, vector<2x8xf32> -> vector<2x32xf32>
    %c0_22 = arith.constant 0 : index
    %c0_23 = arith.constant 0 : index
    %37 = vector.load %arg8[%c0_22, %c0_23] : memref<2x32xf32, #tpu.memory_space<vmem>>, vector<2x32xf32>
    tpu.vector_store %arg8[%c0_22, %c0_23], %36 {strides = array<i32>} : memref<2x32xf32, #tpu.memory_space<vmem>>, vector<2x32xf32>,
    return
  }
}

</mosaic_0001>

<bundles_post_ra>
// kernel: tpu_custom_call.1
= control target key start
LH: loop header
LB: loop body
LE: loop exit
PB: predicated region body
PF: predicated region fallthrough
CT: control target
= control target key end

     0   :  { %14 = vsyncpa [#allocation4], 0  ;;  %s690_s0 = inlined_call_operand.<no memory space> [shape: f32[1], index: 0, kind: input, shape index: {}]   ;;  %s691_s1 = inlined_call_operand.vmem [shape: f32[2,32], index: 1, kind: input, shape index: {}]   ;;  %s692_s2 = inlined_call_operand.hbm [shape: f32[2,32], index: 2, kind: input, shape index: {}]   ;;  %s693_s3 = inlined_call_operand.hbm [shape: f32[2,8,32], index: 3, kind: input, shape index: {}]   ;;  %s694_s4 = inlined_call_operand.hbm [shape: f32[2,8,32], index: 4, kind: input, shape index: {}]   ;;  %s695_s5 = inlined_call_operand.hbm [shape: f32[2,8,32], index: 5, kind: input, shape index: {}]   ;;  %s696_s6 = inlined_call_operand.hbm [shape: f32[2,8,32], index: 6, kind: input, shape index: {}]   ;;  %s697_s7 = inlined_call_operand.hbm [shape: f32[32,32], index: 7, kind: input, shape index: {}]   ;;  %s698_s8 = inlined_call_operand.hbm [shape: f32[2,32], index: 8, kind: output, shape index: {}]  }
   0x1   :  { %15 = vsyncpa [#allocation7], 0 }
   0x2   :  { %16 = vsyncpa [#allocation10], 0 }
   0x3   :  { %17 = vsyncpa [#allocation13], 0 }
   0x4   :  { %18 = vsyncpa [#allocation5], 0  ;;  %s566_s27 = smov [#allocation6]  }
   0x5   :  { %s38_s28 = sshll.u32 %s566_s27, 4  ;;  %s39_s28 = int_to_ptr.vmem [resolvable:$true] %s38_s28 }
   0x6   :  { %s424_s29 = scalar_lea.vmem %s39_s28, 256  ;;  %p429_p1 = scmp.lt.s32.totalorder %s39_s28, %s39_s28 }
   0x7   :  { %p425_p0 = scmp.ne.s32.totalorder %s39_s28, %s424_s29  ;;  %p430_p2 = scmp.lt.s32.totalorder %s424_s29, %s424_s29 }
   0x9   :  { %p431_p3 = por %p430_p2, %p429_p1 }
   0xb   :  { %p432_p4 = pnand %p431_p3, %p425_p0 }
   0xd   :  { %435 = shalt.err (!%p432_p4)
}
   0xe   :  { %s567_s30 = smov 128   ;;  %s568_s9 = smov 8  }
   0xf   :  { %44 = dma.hbm_to_vmem [thread:$0]  %s693_s3, 256, %s39_s28, [#allocation7], %s567_s30, %s567_s30, %s568_s9  }
  0x10   :  { %s569_s12 = smov [#allocation9]   ;;  %s570_s14 = smov [#allocation3]  }
  0x11   :  { %s62_s13 = sshll.u32 %s569_s12, 4  ;;  %s29_s15 = sshll.u32 %s570_s14, 4  ;;  %s63_s13 = int_to_ptr.vmem [resolvable:$true] %s62_s13  ;;  %s30_s15 = int_to_ptr.vmem [resolvable:$true] %s29_s15 }
  0x12   :  { %s444_s16 = scalar_lea.vmem %s63_s13, 256  ;;  %p449_p6 = scmp.lt.s32.totalorder %s63_s13, %s63_s13 }
  0x13   :  { %p445_p5 = scmp.ne.s32.totalorder %s63_s13, %s444_s16  ;;  %p450_p7 = scmp.lt.s32.totalorder %s444_s16, %s444_s16 }
  0x15   :  { %p451_p8 = por %p450_p7, %p449_p6 }
  0x17   :  { %p452_p9 = pnand %p451_p8, %p445_p5 }
  0x19   :  { %455 = shalt.err (!%p452_p9)
}
  0x1a   :  { %68 = dma.hbm_to_vmem [thread:$0]  %s695_s5, 256, %s63_s13, [#allocation10], %s567_s30, %s567_s30, %s568_s9  }
  0x1b   :  { %s464_s3 = scalar_lea.vmem %s30_s15, 32  ;;  %p469_p11 = scmp.lt.s32.totalorder %s30_s15, %s30_s15 }
  0x1c   :  { %p465_p10 = scmp.ne.s32.totalorder %s30_s15, %s464_s3  ;;  %p470_p12 = scmp.lt.s32.totalorder %s464_s3, %s464_s3 }
  0x1e   :  { %p471_p13 = por %p470_p12, %p469_p11 }
  0x20   :  { %p472_p0 = pnand %p471_p13, %p465_p10 }
  0x22   :  { %475 = shalt.err (!%p472_p0)
}
  0x23   :  { %32 = dma.hbm_to_vmem [thread:$0]  %s692_s2, 32, %s30_s15, [#allocation4]  }
  0x24   :  { %s571_s21 = smov [#allocation8]   ;;  %s572_s23 = smov [#allocation11]  }
  0x25   :  { %s50_s22 = sshll.u32 %s571_s21, 4  ;;  %s74_s24 = sshll.u32 %s572_s23, 4  ;;  %s51_s22 = int_to_ptr.vmem [resolvable:$true] %s50_s22  ;;  %s75_s24 = int_to_ptr.vmem [resolvable:$true] %s74_s24 }
  0x26   :  { %s484_s25 = scalar_lea.vmem %s51_s22, 256  ;;  %p489_p2 = scmp.lt.s32.totalorder %s51_s22, %s51_s22 }
  0x27   :  { %p485_p1 = scmp.ne.s32.totalorder %s51_s22, %s484_s25  ;;  %p490_p3 = scmp.lt.s32.totalorder %s484_s25, %s484_s25 }
  0x29   :  { %p491_p4 = por %p490_p3, %p489_p2 }
  0x2b   :  { %p492_p5 = pnand %p491_p4, %p485_p1 }
  0x2d   :  { %495 = shalt.err (!%p492_p5)
}
  0x2e   :  { %56 = dma.hbm_to_vmem [thread:$0]  %s694_s4, 256, %s51_s22, [#allocation7], %s567_s30, %s567_s30, %s568_s9  }
  0x2f   :  { %s504_s2 = scalar_lea.vmem %s75_s24, 256  ;;  %p509_p7 = scmp.lt.s32.totalorder %s75_s24, %s75_s24 }
  0x30   :  { %p505_p6 = scmp.ne.s32.totalorder %s75_s24, %s504_s2  ;;  %p510_p8 = scmp.lt.s32.totalorder %s504_s2, %s504_s2 }
  0x32   :  { %p511_p9 = por %p510_p8, %p509_p7 }
  0x34   :  { %p512_p10 = pnand %p511_p9, %p505_p6 }
  0x36   :  { %515 = shalt.err (!%p512_p10)
}
  0x37   :  { %80 = dma.hbm_to_vmem [thread:$0]  %s696_s6, 256, %s75_s24, [#allocation10], %s567_s30, %s567_s30, %s568_s9  }
  0x38   :  { %s573_s29 = smov [#allocation12]  }
  0x39   :  { %s86_s10 = sshll.u32 %s573_s29, 4  ;;  %s87_s10 = int_to_ptr.vmem [resolvable:$true] %s86_s10 }
  0x3a   :  { %s524_s11 = scalar_lea.vmem %s87_s10, 512  ;;  %p529_p12 = scmp.lt.s32.totalorder %s87_s10, %s87_s10 }
  0x3b   :  { %p525_p11 = scmp.ne.s32.totalorder %s87_s10, %s524_s11  ;;  %p530_p13 = scmp.lt.s32.totalorder %s524_s11, %s524_s11 }
  0x3d   :  { %p531_p0 = por %p530_p13, %p529_p12 }
  0x3f   :  { %p532_p1 = pnand %p531_p0, %p525_p11 }
  0x41   :  { %535 = shalt.err (!%p532_p1)
}
  0x42   :  { %92 = dma.hbm_to_vmem [thread:$0]  %s697_s7, 512, %s87_s10, [#allocation13], %s567_s30, %s567_s30, %s568_s9  }
  0x43   :  { %556 = dma.done.wait [#allocation4], 32  }
  0x44   :  { %557 = vsyncadd [#allocation4], 4294967264 }
  0x45   :  { %558 = dma.done.wait [#allocation7], 512  }
  0x46   :  { %559 = vsyncadd [#allocation7], 4294966784 }
  0x47   :  { %560 = dma.done.wait [#allocation10], 512  }
  0x48   :  { %561 = vsyncadd [#allocation10], 4294966784 }
  0x49   :  { %562 = dma.done.wait [#allocation13], 512  }
  0x4a   :  { %563 = vsyncadd [#allocation13], 4294966784  ;;  %v574_v0 = vmov 0.0   ;;  %vm575_vm0 = vmmov 0   ;;  %vm123_vm1 = vcmask 261120   ;;  %v115_v1 = vld [vmem:[#allocation12 + $0x18] sm:$0xff]  ;;  %v215_v11 = vlaneseq }
  0x4b   :  { %393 = vmatprep.subr.mxu0 %v574_v0  ;;  %401 = vmatprep.mubr.msk.f32.mxu0 %vm575_vm0, %v574_v0  ;;  %v114_v2 = vld [vmem:[#allocation12 + $0x10] sm:$0xff]  ;;  %v113_v3 = vld [vmem:[#allocation12 + $0x8] sm:$0xff]  ;;  %v117_v4 = vld [vmem:[#allocation3] sm:$0x3]  ;;  %vm121_vm2 = vcmask 1041408   ;;  %v252_v57 = vstv %s690_s0  ;;  %vm357_vm3 = vcmask 64512  }
  0x4c   :  { %394 = vmatpush3.xpose.msk.msra.mxu0 %vm123_vm1, %v115_v1  ;;  %v119_v5 = vrot.slane %v117_v4, 6  ;;  %v112_v6 = vld [vmem:[#allocation12] sm:$0xff]  ;;  %v116_v7 = vld [vmem:[%s691_s1] sm:$0x3]  ;;  %v576_v9 = vmov 1966171168  }
  0x4d   :  { %395 = vmatprep.subr.mxu0 %v574_v0  ;;  %v213_v10 = vunpack.c.l.s4 %v576_v9  ;;  %v664_v13 = vshrl.u32 %v215_v11, 7  ;;  %v209_v21 = vld [vmem:[#allocation8] sm:$0xff]  ;;  %v255_v25 = vld [vmem:[#allocation6] sm:$0xff]  ;;  %v280_v30 = vld [vmem:[#allocation11 + $0x8] sm:$0xff]  ;;  %v306_v53 = vand.u32 127, %v215_v11  ;;  %vm315_vm4 = vcmask 1041409  }
  0x4e   :  { %v122_v8 = vsel %vm121_vm2, %v116_v7, %v119_v5  ;;  %v279_v26 = vld [vmem:[#allocation11] sm:$0xff]  ;;  %v210_v35 = vld [vmem:[#allocation8 + $0x8] sm:$0xff]  ;;  %v256_v39 = vld [vmem:[#allocation6 + $0x8] sm:$0xff]  ;;  %vm359_vm5 = vcmask 130048   ;;  %s577_s0 = smov [#allocation14]   ;;  %vm361_vm6 = vcmask 195584  }
  0x4f   :  { %v214_v12 = vunpack.c.0.s8 %v213_v10  ;;  %v236_v17 = vsub.s32 0, %v664_v13  ;;  %v291_v42 = vld [vmem:[#allocation9] sm:$0xff]  ;;  %v292_v45 = vld [vmem:[#allocation9 + $0x8] sm:$0xff]  ;;  %v320_v56 = vadd.s32 4294967288, %v306_v53  ;;  %v309_v59 = vsub.s32 %v306_v53, %v664_v13  ;;  %s371_s9 = sshll.u32 %s577_s0, 4  ;;  %s372_s9 = int_to_ptr.vmem [resolvable:$true] %s371_s9 }
  0x50   :  { %396 = vmatpush3.xpose.msk.msra.mxu0 %vm123_vm1, %v114_v2  ;;  %v333_v60 = vadd.s32 4294967280, %v306_v53  ;;  %v346_v62 = vadd.s32 4294967272, %v306_v53  ;;  %vm363_vm7 = vcmask 254976   ;;  %s536_s13 = scalar_lea.vmem %s372_s9, 32  ;;  %p541_p3 = scmp.lt.s32.totalorder %s372_s9, %s372_s9 }
  0x51   :  { %397 = vmatprep.subr.mxu0 %v574_v0  ;;  %v217_v14 = vsub.s32 %v214_v12, %v664_v13  ;;  %p537_p2 = scmp.ne.s32.totalorder %s372_s9, %s536_s13  ;;  %p542_p4 = scmp.lt.s32.totalorder %s536_s13, %s536_s13 }
  0x52   :  { %v336_v7 = vsub.s32 %v333_v60, %v664_v13  ;;  %v349_v9 = vsub.s32 %v346_v62, %v664_v13 }
  0x53   :  { %p543_p5 = por %p542_p4, %p541_p3 }
  0x54   :  { %398 = vmatpush3.xpose.msk.msra.mxu0 %vm123_vm1, %v113_v3 }
  0x55   :  { %399 = vmatprep.subr.mxu0 %v574_v0  ;;  %v323_v0 = vsub.s32 %v320_v56, %v664_v13  ;;  %p544_p6 = pnand %p543_p5, %p537_p2 }
  0x58   :  { %400 = vmatpush3.xpose.msk.msra.mxu0 %vm123_vm1, %v112_v6 }
  0x5b   :  { %402 = vmatmul.mubr.msk.f32.vlgmr.msra.gmra.mxu0 %vm123_vm1, %v122_v8 }
 0x11b   :  { %v205_v15 = vpop.f32.mrf.mxu0 }
 0x11c   :  { %v218_v16 = vrot.slane %v205_v15, %v217_v14 }
 0x11d   :  { %v403_v18 = vpop.f32.mrf.mxu0 }
 0x11e   :  { %v219_v19 = vcombine.high %v218_v16, %v218_v16  ;;  %v226_v20 = vrot.slane %v218_v16, %v217_v14 }
 0x120   :  { %v233_v22 = vrot.slane %v219_v19, %v217_v14  ;;  %v257_v23 = vcombine.high %v226_v20, %v226_v20  ;;  %v237_v24 = vrot.slane %v226_v20, %v236_v17 }
 0x122   :  { %v244_v27 = vmul.f32 %v237_v24, %v209_v21  ;;  %v262_v28 = vrot.slane %v257_v23, %v236_v17  ;;  %v241_v29 = vrot.slane %v233_v22, %v236_v17  ;;  %v258_v31 = vcombine.high %v233_v22, %v233_v22 }
 0x123   :  { %v281_v34 = vmul.f32 %v279_v26, %v237_v24 }
 0x124   :  { %v246_v32 = vsel %vm123_vm1, %v244_v27, 0.0  ;;  %v269_v33 = vmul.f32 %v262_v28, %v255_v25  ;;  %v282_v37 = vmul.f32 %v280_v30, %v241_v29  ;;  %v266_v38 = vrot.slane %v258_v31, %v236_v17 }
 0x125   :  { %247 = vadd.xlane.f32.xlu0 %v246_v32  ;;  %v283_v40 = vsel %vm123_vm1, %v281_v34, 0.0  ;;  %v245_v41 = vmul.f32 %v241_v29, %v210_v35  ;;  %v293_v47 = vmul.f32 %v291_v42, %v262_v28 }
 0x126   :  { %v271_v36 = vsel %vm123_vm1, %v269_v33, 0.0  ;;  %v286_v43 = vsel %vm123_vm1, %v282_v37, 0.0  ;;  %v270_v44 = vmul.f32 %v266_v38, %v256_v39  ;;  %v294_v49 = vmul.f32 %v292_v45, %v266_v38 }
 0x127   :  { %272 = vadd.xlane.f32.xlu1 %v271_v36  ;;  %v249_v46 = vsel %vm123_vm1, %v245_v41, 0.0  ;;  %v295_v50 = vsel %vm123_vm1, %v293_v47, 0.0 }
 0x128   :  { %v274_v48 = vsel %vm123_vm1, %v270_v44, 0.0  ;;  %v298_v51 = vsel %vm123_vm1, %v294_v49, 0.0 }
 0x129   :  { %284 = vadd.xlane.f32.xlu0 %v283_v40 }
 0x12b   :  { %287 = vadd.xlane.f32.xlu1 %v286_v43 }
 0x12d   :  { %250 = vadd.xlane.f32.xlu0 %v249_v46 }
 0x12f   :  { %275 = vadd.xlane.f32.xlu1 %v274_v48 }
 0x131   :  { %296 = vadd.xlane.f32.xlu0 %v295_v50 }
 0x133   :  { %299 = vadd.xlane.f32.xlu1 %v298_v51 }
 0x1ae   :  { %v248_v52 = vpop.xlane.xlu0 %247 }
 0x1af   :  { %v253_v63 = vadd.f32 %v252_v57, %v248_v52 }
 0x1b0   :  { %v273_v54 = vpop.xlane.xlu1 %272 }
 0x1b1   :  { %v277_v1 = vadd.f32 %v273_v54, %v252_v57  ;;  %v310_v11 = vrot.slane %v253_v63, %v309_v59 }
 0x1b2   :  { %v285_v55 = vpop.xlane.xlu0 %284 }
 0x1b3   :  { %v289_v8 = vadd.f32 %v285_v55, %v252_v57  ;;  %v324_v12 = vrot.slane %v277_v1, %v323_v0 }
 0x1b4   :  { %v288_v58 = vpop.xlane.xlu1 %287 }
 0x1b5   :  { %v290_v3 = vadd.f32 %v288_v58, %v252_v57  ;;  %v337_v21 = vrot.slane %v289_v8, %v336_v7 }
 0x1b6   :  { %v251_v61 = vpop.xlane.xlu0 %250 }
 0x1b7   :  { %v254_v2 = vadd.f32 %v252_v57, %v251_v61  ;;  %v341_v16 = vrot.slane %v290_v3, %v336_v7 }
 0x1b8   :  { %v276_v4 = vpop.xlane.xlu1 %275 }
 0x1b9   :  { %v314_v5 = vrot.slane %v254_v2, %v309_v59  ;;  %v278_v6 = vadd.f32 %v276_v4, %v252_v57  ;;  %v342_v24 = vsel %vm315_vm4, %v341_v16, %v337_v21 }
 0x1ba   :  { %v297_v10 = vpop.xlane.xlu0 %296 }
 0x1bb   :  { %v328_v14 = vrot.slane %v278_v6, %v323_v0  ;;  %v301_v15 = vadd.f32 %v297_v10, %v252_v57  ;;  %v316_v18 = vsel %vm315_vm4, %v314_v5, %v310_v11 }
 0x1bc   :  { %v300_v17 = vpop.xlane.xlu1 %299 }
 0x1bd   :  { %v329_v19 = vsel %vm315_vm4, %v328_v14, %v324_v12  ;;  %v302_v20 = vadd.f32 %v300_v17, %v252_v57  ;;  %v350_v13 = vrot.slane %v301_v15, %v349_v9 }
 0x1be   :  { %v358_v22 = vsel %vm357_vm3, %v316_v18, %v329_v19 }
 0x1bf   :  { %v354_v23 = vrot.slane %v302_v20, %v349_v9  ;;  %v360_v26 = vsel %vm359_vm5, %v358_v22, %v342_v24 }
 0x1c1   :  { %v355_v25 = vsel %vm315_vm4, %v354_v23, %v350_v13 }
 0x1c2   :  { %v362_v27 = vsel %vm361_vm6, %v360_v26, %v355_v25 }
 0x1c3   :  { %364 = vst.msk [vmem:[#allocation14] sm:$0x3] %vm363_vm7, %v362_v27 }
 0x1c4   :  { %547 = shalt.err (!%p544_p6)
}
 0x1c5   :  { %374 = dma.vmem_to_hbm [thread:$0]  %s372_s9, 32, %s698_s8, [#allocation5]  }
 0x1c6   :  { %564 = dma.done.wait [#allocation5], 32  }
 0x1c7   :  { %565 = vsyncadd [#allocation5], 4294967264 }
 0x1c8   :  { %378 = vsyncpa [#allocation4], 1 }
 0x1c9   :  { %379 = vsyncpa [#allocation7], 1 }
 0x1ca   :  { %380 = vsyncpa [#allocation10], 1 }
 0x1cb   :  { %381 = vsyncpa [#allocation13], 1 }
 0x1cc   :  { %382 = vsyncpa [#allocation5], 1 }

</bundles_post_ra>
